<compile_context>
chip_gen: v7x
topology: tpu7x:2x2x1
jax: 0.10.0
libtpu: 0.0.40
codegen_flags: <defaults>
</compile_context>

<pallas_src>
import jax
import jax.numpy as jnp
from jax import lax
from jax.experimental import pallas as pl
from jax.experimental.pallas import tpu as pltpu


def highway_kernel(x_ref, w_ref, b_ref, o_ref):
    """All L highway layers in one kernel invocation; x carried in vregs."""
    S = x_ref.shape[-1]
    L = w_ref.shape[0]

    x0 = x_ref[...].astype(jnp.float32)                # (B, S)

    def layer(l, x):
        # Fused gate|nonlinear projection: one (B,S)@(S,2S) MXU push + one bias add.
        y = jnp.dot(x, w_ref[l], preferred_element_type=jnp.float32) + b_ref[l]  # (B, 2S)
        gate = jax.nn.sigmoid(y[:, :S])                # σ(G(x))
        nonlinear = jnp.maximum(y[:, S:], 0.0)         # f(Q(x)), f = ReLU
        # gate*nonlinear + (1-gate)*x  ==  x + gate*(nonlinear - x)
        return x + gate * (nonlinear - x)

    x_out = lax.fori_loop(0, L, layer, x0, unroll=True)
    o_ref[...] = x_out.astype(o_ref.dtype)


def highway(x, wg, bg, wn, bn):
    """
    x : (B, S)        float32
    wg: (L, S, S)     gate weights       (pre-transposed: y = x @ wg[l] + bg[l])
    bg: (L, 1, S)     gate biases
    wn: (L, S, S)     nonlinear weights  (pre-transposed)
    bn: (L, 1, S)     nonlinear biases
    returns (B, S) float32
    """
    B, S = x.shape

    # Fuse the two projections per layer into a single (S, 2S) matmul and a
    # single (1, 2S) bias (also removes two of the five kernel inputs).
    w_fused = jnp.concatenate([wg, wn], axis=-1)       # (L, S, 2S)
    b_fused = jnp.concatenate([bg, bn], axis=-1)       # (L, 1, 2S)

    return pl.pallas_call(
        highway_kernel,
        out_shape=jax.ShapeDtypeStruct((B, S), x.dtype),
        in_specs=[
            pl.BlockSpec(memory_space=pltpu.MemorySpace.VMEM),  # x
            pl.BlockSpec(memory_space=pltpu.MemorySpace.VMEM),  # fused weights
            pl.BlockSpec(memory_space=pltpu.MemorySpace.VMEM),  # fused biases
        ],
        out_specs=pl.BlockSpec(memory_space=pltpu.MemorySpace.VMEM),
    )(x, w_fused, b_fused)


def highway_ref(x, wg, bg, wn, bn):
    """Pure-JAX reference matching the PyTorch forward (f = ReLU)."""
    L = wg.shape[0]
    for l in range(L):
        gate = jax.nn.sigmoid(x @ wg[l] + bg[l, 0])
        nonlinear = jnp.maximum(x @ wn[l] + bn[l, 0], 0.0)
        x = gate * nonlinear + (1.0 - gate) * x
    return x


if __name__ == "__main__":
    # Module config: Highway(size=32, num_layers=2, f=ReLU)
    SIZE = 32
    NUM_LAYERS = 2
    BATCH = 8

    key = jax.random.PRNGKey(0)
    kx, kwg, kbg, kwn, kbn = jax.random.split(key, 5)

    x = jax.random.normal(kx, (BATCH, SIZE), dtype=jnp.float32)

    # Deterministic parameter init (PyTorch nn.Linear-like uniform scale).
    bound = 1.0 / jnp.sqrt(SIZE)
    wg = jax.random.uniform(kwg, (NUM_LAYERS, SIZE, SIZE), jnp.float32, -bound, bound)
    bg = jax.random.uniform(kbg, (NUM_LAYERS, 1, SIZE), jnp.float32, -bound, bound)
    wn = jax.random.uniform(kwn, (NUM_LAYERS, SIZE, SIZE), jnp.float32, -bound, bound)
    bn = jax.random.uniform(kbn, (NUM_LAYERS, 1, SIZE), jnp.float32, -bound, bound)

    out = highway(x, wg, bg, wn, bn)
    jax.block_until_ready(out)

    ref = highway_ref(x, wg, bg, wn, bn)
    assert out.shape == (BATCH, SIZE)
    assert jnp.allclose(out, ref, atol=1e-5, rtol=1e-5), "mismatch vs reference"

    print("KERNEL_OK")
</pallas_src>

<mosaic_0001>
module attributes {stable_mosaic.version = 11 : i64} {
  func.func @highway_kernel(%arg0: memref<8x32xf32, #tpu.memory_space<vmem>>, %arg1: memref<2x32x64xf32, #tpu.memory_space<vmem>>, %arg2: memref<2x1x64xf32, #tpu.memory_space<vmem>>, %arg3: memref<8x32xf32, #tpu.memory_space<vmem>>) attributes {dimension_semantics = [], scalar_prefetch = 0 : i64, scratch_operands = 0 : i64, tpu.core_type = #tpu.core_type<tc>} {
    %c0 = arith.constant 0 : index
    %c0_0 = arith.constant 0 : index
    %0 = vector.load %arg0[%c0, %c0_0] : memref<8x32xf32, #tpu.memory_space<vmem>>, vector<8x32xf32>
    %c0_i32 = arith.constant 0 : i32
    %1 = arith.index_cast %c0_i32 : i32 to index
    %c0_1 = arith.constant 0 : index
    %c0_2 = arith.constant 0 : index
    %2 = vector.load %arg1[%1, %c0_1, %c0_2] : memref<2x32x64xf32, #tpu.memory_space<vmem>>, vector<1x32x64xf32>
    %3 = vector.shape_cast %2 : vector<1x32x64xf32> to vector<32x64xf32>
    %cst = arith.constant dense<0.000000e+00> : vector<8x64xf32>
    %4 = tpu.matmul %0, %3, %cst {dimension_numbers = #tpu.dot_dimension_numbers<[1], [0], [0], [1], [0, 0, 1, 1], [], []>} : vector<8x32xf32>, vector<32x64xf32>, vector<8x64xf32> -> vector<8x64xf32>
    %5 = arith.index_cast %c0_i32 : i32 to index
    %c0_3 = arith.constant 0 : index
    %c0_4 = arith.constant 0 : index
    %6 = vector.load %arg2[%5, %c0_3, %c0_4] : memref<2x1x64xf32, #tpu.memory_space<vmem>>, vector<1x1x64xf32>
    %7 = vector.shape_cast %6 : vector<1x1x64xf32> to vector<1x64xf32>
    %8 = vector.broadcast %7 : vector<1x64xf32> to vector<8x64xf32>
    %9 = arith.addf %4, %8 : vector<8x64xf32>
    %10 = vector.extract_strided_slice %9 {offsets = [0, 0], sizes = [8, 32], strides = [1, 1]} : vector<8x64xf32> to vector<8x32xf32>
    %11 = arith.negf %10 : vector<8x32xf32>
    %12 = math.exp %11 : vector<8x32xf32>
    %cst_5 = arith.constant 1.000000e+00 : f32
    %13 = vector.broadcast %cst_5 : f32 to vector<8x32xf32>
    %14 = arith.addf %13, %12 : vector<8x32xf32>
    %15 = arith.divf %13, %14 : vector<8x32xf32>
    %16 = vector.extract_strided_slice %9 {offsets = [0, 32], sizes = [8, 32], strides = [1, 1]} : vector<8x64xf32> to vector<8x32xf32>
    %cst_6 = arith.constant 0.000000e+00 : f32
    %17 = vector.broadcast %cst_6 : f32 to vector<8x32xf32>
    %18 = arith.maximumf %16, %17 : vector<8x32xf32>
    %19 = arith.subf %18, %0 : vector<8x32xf32>
    %20 = arith.mulf %15, %19 : vector<8x32xf32>
    %21 = arith.addf %0, %20 : vector<8x32xf32>
    %c1_i32 = arith.constant 1 : i32
    %22 = arith.index_cast %c1_i32 : i32 to index
    %c0_7 = arith.constant 0 : index
    %c0_8 = arith.constant 0 : index
    %23 = vector.load %arg1[%22, %c0_7, %c0_8] : memref<2x32x64xf32, #tpu.memory_space<vmem>>, vector<1x32x64xf32>
    %24 = vector.shape_cast %23 : vector<1x32x64xf32> to vector<32x64xf32>
    %cst_9 = arith.constant dense<0.000000e+00> : vector<8x64xf32>
    %25 = tpu.matmul %21, %24, %cst_9 {dimension_numbers = #tpu.dot_dimension_numbers<[1], [0], [0], [1], [0, 0, 1, 1], [], []>} : vector<8x32xf32>, vector<32x64xf32>, vector<8x64xf32> -> vector<8x64xf32>
    %26 = arith.index_cast %c1_i32 : i32 to index
    %c0_10 = arith.constant 0 : index
    %c0_11 = arith.constant 0 : index
    %27 = vector.load %arg2[%26, %c0_10, %c0_11] : memref<2x1x64xf32, #tpu.memory_space<vmem>>, vector<1x1x64xf32>
    %28 = vector.shape_cast %27 : vector<1x1x64xf32> to vector<1x64xf32>
    %29 = vector.broadcast %28 : vector<1x64xf32> to vector<8x64xf32>
    %30 = arith.addf %25, %29 : vector<8x64xf32>
    %31 = vector.extract_strided_slice %30 {offsets = [0, 0], sizes = [8, 32], strides = [1, 1]} : vector<8x64xf32> to vector<8x32xf32>
    %32 = arith.negf %31 : vector<8x32xf32>
    %33 = math.exp %32 : vector<8x32xf32>
    %cst_12 = arith.constant 1.000000e+00 : f32
    %34 = vector.broadcast %cst_12 : f32 to vector<8x32xf32>
    %35 = arith.addf %34, %33 : vector<8x32xf32>
    %36 = arith.divf %34, %35 : vector<8x32xf32>
    %37 = vector.extract_strided_slice %30 {offsets = [0, 32], sizes = [8, 32], strides = [1, 1]} : vector<8x64xf32> to vector<8x32xf32>
    %cst_13 = arith.constant 0.000000e+00 : f32
    %38 = vector.broadcast %cst_13 : f32 to vector<8x32xf32>
    %39 = arith.maximumf %37, %38 : vector<8x32xf32>
    %40 = arith.subf %39, %21 : vector<8x32xf32>
    %41 = arith.mulf %36, %40 : vector<8x32xf32>
    %42 = arith.addf %21, %41 : vector<8x32xf32>
    %c2_i32 = arith.constant 2 : i32
    %c0_14 = arith.constant 0 : index
    %c0_15 = arith.constant 0 : index
    %43 = vector.load %arg3[%c0_14, %c0_15] : memref<8x32xf32, #tpu.memory_space<vmem>>, vector<8x32xf32>
    tpu.vector_store %arg3[%c0_14, %c0_15], %42 {strides = array<i32>} : memref<8x32xf32, #tpu.memory_space<vmem>>, vector<8x32xf32>,
    return
  }
}

</mosaic_0001>

<bundles_post_ra>
// kernel: tpu_custom_call.1
= control target key start
LH: loop header
LB: loop body
LE: loop exit
PB: predicated region body
PF: predicated region fallthrough
CT: control target
= control target key end

     0   :  { %8 = vsyncpa [#allocation3], 0  ;;  %s489_s0 = inlined_call_operand.hbm [shape: f32[8,32], index: 0, kind: input, shape index: {}]   ;;  %s490_s1 = inlined_call_operand.hbm [shape: f32[2,32,64], index: 1, kind: input, shape index: {}]   ;;  %s491_s2 = inlined_call_operand.vmem [shape: f32[2,1,64], index: 2, kind: input, shape index: {}]   ;;  %s492_s3 = inlined_call_operand.hbm [shape: f32[8,32], index: 3, kind: output, shape index: {}]  }
   0x1   :  { %9 = vsyncpa [#allocation6], 0 }
   0x2   :  { %10 = vsyncpa [#allocation4], 0  ;;  %s405_s12 = smov [#allocation2]   ;;  %s406_s14 = smov [#allocation5]  }
   0x3   :  { %s17_s13 = sshll.u32 %s405_s12, 4  ;;  %s26_s15 = sshll.u32 %s406_s14, 4  ;;  %s18_s13 = int_to_ptr.vmem [resolvable:$true] %s17_s13  ;;  %s435_s15 = int_to_ptr.vmem [resolvable:$true] %s26_s15 }
   0x4   :  { %s333_s18 = scalar_lea.hbm %s489_s0, 128 }
   0x5   :  { %p334_p0 = scmp.ne.s32.totalorder %s489_s0, %s333_s18  ;;  %p337_p1 = scmp.lt.u32.totalorder %s333_s18, %s489_s0 }
   0x7   :  { %p339_p2 = pnand %p337_p1, %p334_p0 }
   0x9   :  { %342 = shalt.err (!%p339_p2)
}
   0xa   :  { %s343_s23 = scalar_lea.vmem %s18_s13, 128  ;;  %p348_p4 = scmp.lt.s32.totalorder %s18_s13, %s18_s13 }
   0xb   :  { %p344_p3 = scmp.ne.s32.totalorder %s18_s13, %s343_s23  ;;  %p349_p5 = scmp.lt.s32.totalorder %s343_s23, %s343_s23 }
   0xd   :  { %p350_p6 = por %p349_p5, %p348_p4 }
   0xf   :  { %p351_p7 = pnand %p350_p6, %p344_p3 }
  0x11   :  { %354 = shalt.err (!%p351_p7)
}
  0x12   :  { %20 = dma.hbm_to_vmem [thread:$0]  %s489_s0, 128, %s18_s13, [#allocation3]  }
  0x13   :  { %s355_s28 = scalar_lea.hbm %s490_s1, 1024 }
  0x14   :  { %p356_p8 = scmp.ne.s32.totalorder %s490_s1, %s355_s28  ;;  %p359_p9 = scmp.lt.u32.totalorder %s355_s28, %s490_s1 }
  0x16   :  { %p361_p10 = pnand %p359_p9, %p356_p8 }
  0x18   :  { %364 = shalt.err (!%p361_p10)
}
  0x19   :  { %s365_s6 = scalar_lea.vmem %s435_s15, 1024  ;;  %p370_p12 = scmp.lt.s32.totalorder %s435_s15, %s435_s15 }
  0x1a   :  { %p366_p11 = scmp.ne.s32.totalorder %s435_s15, %s365_s6  ;;  %p371_p13 = scmp.lt.s32.totalorder %s365_s6, %s365_s6 }
  0x1c   :  { %p372_p0 = por %p371_p13, %p370_p12 }
  0x1e   :  { %p373_p1 = pnand %p372_p0, %p366_p11 }
  0x20   :  { %376 = shalt.err (!%p373_p1)
}
  0x21   :  { %s407_s0 = smov 128   ;;  %s408_s7 = smov 8  }
  0x22   :  { %32 = dma.hbm_to_vmem [thread:$0]  %s490_s1, 1024, %s435_s15, [#allocation6], %s407_s0, %s407_s0, %s408_s7  }
  0x23   :  { %399 = dma.done.wait [#allocation3], 128  }
  0x24   :  { %400 = vsyncadd [#allocation3], 4294967168 }
  0x25   :  { %401 = dma.done.wait [#allocation6], 1024  }
  0x26   :  { %402 = vsyncadd [#allocation6], 4294966272  ;;  %v409_v0 = vmov 0.0|0.0   ;;  %vm410_vm0 = vmmov 0   ;;  %v411_v1 = vmov 0.0   ;;  %v42_v2 = vld [vmem:[#allocation5] sm:$0xff] }
  0x27   :  { %303 = vmatprep.subr.bf16.mxu0 %v409_v0  ;;  %289 = vmatprep.mubr.msk.f32.mxu0 %vm410_vm0, %v411_v1  ;;  %v43_v3 = vld [vmem:[#allocation5 + $0x8] sm:$0xff]  ;;  %v44_v4 = vld [vmem:[#allocation5 + $0x10] sm:$0xff]  ;;  %v45_v6 = vld [vmem:[#allocation5 + $0x18] sm:$0xff]  ;;  %s412_s10 = smov 32   ;;  %vm53_vm1 = vcmask 261120   ;;  %s413_s12 = smov 96  }
  0x28   :  { %309 = vmatprep.subr.bf16.mxu1 %v409_v0  ;;  %300 = vmatprep.mubr.msk.f32.mxu1 %vm410_vm0, %v411_v1  ;;  %v304_v5 = vpack.c.bf16 %v43_v3, %v42_v2  ;;  %v41_v7 = vld [vmem:[#allocation2] sm:$0xff]  ;;  %v307_v8 = vpack.c.bf16 %v45_v6, %v44_v4  ;;  %v145_v9 = vld [vmem:[#allocation5 + $0x20] sm:$0xff]  ;;  %v146_v10 = vld [vmem:[#allocation5 + $0x28] sm:$0xff]  ;;  %s414_s15 = smov [#allocation7]  }
  0x29   :  { %134 = vrot.lane.b32.xlu0 %v41_v7, %s412_s10  ;;  %v310_v11 = vpack.c.bf16 %v146_v10, %v145_v9  ;;  %v147_v12 = vld [vmem:[#allocation5 + $0x30] sm:$0xff]  ;;  %v148_v13 = vld [vmem:[#allocation5 + $0x38] sm:$0xff]  ;;  %s254_s16 = sshll.u32 %s414_s15, 4  ;;  %s255_s16 = int_to_ptr.vmem [resolvable:$true] %s254_s16 }
  0x2a   :  { %305 = vmatpush3.bf16.msra.mxu0 %v304_v5  ;;  %v313_v14 = vpack.c.bf16 %v148_v13, %v147_v12  ;;  %v264_v15 = vld [vmem:[%s491_s2] ss:$0 sm:$0xff]  ;;  %v268_v29 = vld [vmem:[%s491_s2 + $0x1] ss:$0 sm:$0xff]  ;;  %s377_s2 = scalar_lea.vmem %s255_s16, 128  ;;  %p382_p3 = scmp.lt.s32.totalorder %s255_s16, %s255_s16 }
  0x2b   :  { %306 = vmatprep.subr.bf16.mxu0 %v409_v0  ;;  %311 = vmatpush3.bf16.msra.mxu1 %v310_v11  ;;  %p378_p2 = scmp.ne.s32.totalorder %s255_s16, %s377_s2  ;;  %p383_p4 = scmp.lt.s32.totalorder %s377_s2, %s377_s2 }
  0x2c   :  { %312 = vmatprep.subr.bf16.mxu1 %v409_v0 }
  0x2d   :  { %p384_p5 = por %p383_p4, %p382_p3 }
  0x2e   :  { %308 = vmatpush3.bf16.msra.mxu0 %v307_v8 }
  0x2f   :  { %314 = vmatpush3.bf16.msra.mxu1 %v313_v14  ;;  %p385_p6 = pnand %p384_p5, %p378_p2 }
  0x31   :  { %290 = vmatmul.mubr.msk.f32.vlgmr.msra.gmra.mrb[0].mxu0 %vm53_vm1, %v41_v7 }
  0x9b   :  { %v135_v19 = vpop.permute.xlu0 %134 }
 0x104   :  { %v123_v16 = vpop.f32.mrb[0].mxu0 }
 0x105   :  { %v124_v17 = vadd.f32 %v264_v15, %v123_v16  ;;  %v291_v18 = vpop.f32.mrb[1].mxu0 }
 0x107   :  { %v133_v20 = vmax.f32 %v124_v17, 0.0  ;;  %v266_v22 = vmul.f32 -1.442695, %v124_v17 }
 0x109   :  { %v137_v21 = vsub.f32 %v133_v20, %v135_v19  ;;  %325 = vpow2.f32 %v266_v22 }
 0x10b   :  { %139 = vrot.lane.b32.xlu0 %v137_v21, %s413_s12 }
 0x113   :  { %v326_v23 = vpop.eup %325 }
 0x114   :  { %v130_v24 = vadd.f32 1.0, %v326_v23 }
 0x116   :  { %327 = vrcp.f32 %v130_v24 }
 0x120   :  { %v328_v25 = vpop.eup %327 }
 0x17d   :  { %v140_v26 = vpop.permute.xlu0 %139 }
 0x17e   :  { %v142_v27 = vmul.f32 %v328_v25, %v140_v26 }
 0x180   :  { %v143_v28 = vadd.f32 %v142_v27, %v41_v7 }
 0x182   :  { %237 = vrot.lane.b32.xlu1 %v143_v28, %s412_s10  ;;  %301 = vmatmul.mubr.msk.f32.vlgmr.msra.gmra.mrb[0].mxu1 %vm53_vm1, %v143_v28 }
 0x1f4   :  { %v238_v34 = vpop.permute.xlu1 %237 }
 0x255   :  { %v226_v30 = vpop.f32.mrb[0].mxu1 }
 0x256   :  { %v227_v31 = vadd.f32 %v268_v29, %v226_v30  ;;  %v302_v32 = vpop.f32.mrb[1].mxu1 }
 0x258   :  { %v236_v33 = vmax.f32 %v227_v31, 0.0  ;;  %v270_v36 = vmul.f32 -1.442695, %v227_v31 }
 0x25a   :  { %v240_v35 = vsub.f32 %v236_v33, %v238_v34  ;;  %329 = vpow2.f32 %v270_v36 }
 0x25c   :  { %242 = vrot.lane.b32.xlu1 %v240_v35, %s413_s12 }
 0x264   :  { %v330_v37 = vpop.eup %329 }
 0x265   :  { %v233_v38 = vadd.f32 1.0, %v330_v37 }
 0x267   :  { %331 = vrcp.f32 %v233_v38 }
 0x271   :  { %v332_v39 = vpop.eup %331 }
 0x2ce   :  { %v243_v40 = vpop.permute.xlu1 %242 }
 0x2cf   :  { %v245_v41 = vmul.f32 %v332_v39, %v243_v40 }
 0x2d1   :  { %v246_v42 = vadd.f32 %v245_v41, %v143_v28 }
 0x2d3   :  { %247 = vst.msk [vmem:[#allocation7] sm:$0xff] %vm53_vm1, %v246_v42 }
 0x2d4   :  { %388 = shalt.err (!%p385_p6)
}
 0x2d5   :  { %s389_s19 = scalar_lea.hbm %s492_s3, 128 }
 0x2d6   :  { %p390_p7 = scmp.ne.s32.totalorder %s492_s3, %s389_s19  ;;  %p393_p8 = scmp.lt.u32.totalorder %s389_s19, %s492_s3 }
 0x2d8   :  { %p395_p9 = pnand %p393_p8, %p390_p7 }
 0x2da   :  { %398 = shalt.err (!%p395_p9)
}
 0x2db   :  { %257 = dma.vmem_to_hbm [thread:$0]  %s255_s16, 128, %s492_s3, [#allocation4]  }
 0x2dc   :  { %403 = dma.done.wait [#allocation4], 128  }
 0x2dd   :  { %404 = vsyncadd [#allocation4], 4294967168 }
 0x2de   :  { %261 = vsyncpa [#allocation3], 1 }
 0x2df   :  { %262 = vsyncpa [#allocation6], 1 }
 0x2e0   :  { %263 = vsyncpa [#allocation4], 1 }

</bundles_post_ra>
